<compile_context>
chip_gen: v7x
topology: tpu7x:2x2x1
jax: 0.10.0
libtpu: 0.0.40
codegen_flags: <defaults>
</compile_context>

<pallas_src>
import functools

import jax
import jax.numpy as jnp
import numpy as np
from jax import lax
from jax.experimental import pallas as pl
from jax.experimental.pallas import tpu as pltpu


def msa_kernel(x_ref, w_ref, b_ref, o_ref, *, n_heads, d_head):
    """One grid step = one batch element. Fused QKV projection + per-head attention."""
    D = n_heads * d_head
    x = x_ref[0]                                                     # (S, D)

    # Single fused projection: columns [0:D) = scaled Q, [D:2D) = K, [2D:3D) = V,
    # each laid out per-head block-diagonally. Scale already folded into W/b.
    qkv = jnp.dot(x, w_ref[...], preferred_element_type=jnp.float32) + b_ref[0]  # (S, 3D)

    outs = []
    for h in range(n_heads):                                         # small static unroll
        lo = h * d_head
        q = qkv[:, lo:lo + d_head]                                   # (S, d_head), pre-scaled
        k = qkv[:, D + lo:D + lo + d_head]
        v = qkv[:, 2 * D + lo:2 * D + lo + d_head]

        # Scores without materializing k.T: contract the shared last dim on the MXU.
        s = lax.dot_general(
            q.astype(jnp.bfloat16), k.astype(jnp.bfloat16),
            dimension_numbers=(((1,), (1,)), ((), ())),
            preferred_element_type=jnp.float32)                      # (S, S), f32 acc

        # Softmax in f32; denominator reciprocal on the EUP.
        s = s - jnp.max(s, axis=-1, keepdims=True)
        p = jnp.exp(s)
        p = p * pl.reciprocal(jnp.sum(p, axis=-1, keepdims=True), approx=True)

        out_h = lax.dot_general(
            p.astype(jnp.bfloat16), v.astype(jnp.bfloat16),
            dimension_numbers=(((1,), (0,)), ((), ())),
            preferred_element_type=jnp.float32)                      # (S, d_head)
        outs.append(out_h)

    # Single lane-dense (S, D) store per grid step.
    o_ref[0] = jnp.concatenate(outs, axis=-1).astype(o_ref.dtype)


def _fuse_qkv_params(wq, bq, wk, bk, wv, bv):
    """Build block-diagonal (D, 3D) weight stored (in, out) and a (1, 3D) bias,
    with the 1/sqrt(d_head) attention scale folded into the Q pieces."""
    n_heads, d_head, _ = wq.shape
    D = n_heads * d_head
    scale = 1.0 / float(d_head) ** 0.5
    w = jnp.zeros((D, 3 * D), dtype=wq.dtype)
    b = jnp.zeros((1, 3 * D), dtype=bq.dtype)
    for h in range(n_heads):
        r = slice(h * d_head, (h + 1) * d_head)
        w = w.at[r, 0 * D + h * d_head:0 * D + (h + 1) * d_head].set((scale * wq[h]).T)
        w = w.at[r, 1 * D + h * d_head:1 * D + (h + 1) * d_head].set(wk[h].T)
        w = w.at[r, 2 * D + h * d_head:2 * D + (h + 1) * d_head].set(wv[h].T)
        b = b.at[0, 0 * D + h * d_head:0 * D + (h + 1) * d_head].set(scale * bq[h])
        b = b.at[0, 1 * D + h * d_head:1 * D + (h + 1) * d_head].set(bk[h])
        b = b.at[0, 2 * D + h * d_head:2 * D + (h + 1) * d_head].set(bv[h])
    return w, b


def my_msa(x, wq, bq, wk, bk, wv, bv):
    B, S, D = x.shape
    n_heads, d_head, _ = wq.shape
    assert n_heads * d_head == D

    w_fused, b_fused = _fuse_qkv_params(wq, bq, wk, bk, wv, bv)

    kernel = functools.partial(msa_kernel, n_heads=n_heads, d_head=d_head)

    x_spec = pl.BlockSpec((1, S, D), lambda b: (b, 0, 0))
    w_spec = pl.BlockSpec((D, 3 * D), lambda b: (0, 0))
    b_spec = pl.BlockSpec((1, 3 * D), lambda b: (0, 0))
    o_spec = pl.BlockSpec((1, S, D), lambda b: (b, 0, 0))

    # Explicit scoped-VMEM budget: double-buffered x/out blocks, fused weights/bias,
    # qkv + per-head score/prob/output scratch (f32 upper bound), plus 2x headroom.
    est = 4 * (2 * S * D          # x (double-buffered)
               + 2 * S * D        # out (double-buffered)
               + D * 3 * D + 3 * D
               + 3 * S * D        # qkv
               + 2 * S * S        # scores + probs
               + S * D)           # concatenated output temp
    vmem_limit = int(min(max(2 * est, 8 * 1024 * 1024), 64 * 1024 * 1024))

    return pl.pallas_call(
        kernel,
        out_shape=jax.ShapeDtypeStruct((B, S, D), x.dtype),
        grid=(B,),
        in_specs=[x_spec, w_spec, b_spec],
        out_specs=o_spec,
        compiler_params=pltpu.CompilerParams(
            dimension_semantics=("parallel",),
            vmem_limit_bytes=vmem_limit,
        ),
    )(x, w_fused, b_fused)


def my_msa_ref(x, wq, bq, wk, bk, wv, bv):
    """Pure-JAX f32 reference mirroring the PyTorch loop semantics."""
    B, S, D = x.shape
    n_heads, d_head, _ = wq.shape
    outs = []
    for h in range(n_heads):
        seq = x[:, :, h * d_head:(h + 1) * d_head]
        q = jnp.einsum("bsi,oi->bso", seq, wq[h]) + bq[h]
        k = jnp.einsum("bsi,oi->bso", seq, wk[h]) + bk[h]
        v = jnp.einsum("bsi,oi->bso", seq, wv[h]) + bv[h]
        s = jnp.einsum("bqd,bkd->bqk", q, k) / d_head ** 0.5
        p = jax.nn.softmax(s, axis=-1)
        outs.append(jnp.einsum("bqk,bkd->bqd", p, v))
    return jnp.concatenate(outs, axis=-1)


if __name__ == "__main__":
    B, S, D, n_heads = 2, 8, 32, 2
    d_head = D // n_heads

    key = jax.random.PRNGKey(0)
    kx, kwq, kbq, kwk, kbk, kwv, kbv = jax.random.split(key, 7)

    x = jax.random.normal(kx, (B, S, D), dtype=jnp.float32)
    # Per-head Linear(d_head, d_head) weights (out, in) and biases, PyTorch-style init range.
    bound = 1.0 / d_head ** 0.5
    wq = jax.random.uniform(kwq, (n_heads, d_head, d_head), jnp.float32, -bound, bound)
    bq = jax.random.uniform(kbq, (n_heads, d_head), jnp.float32, -bound, bound)
    wk = jax.random.uniform(kwk, (n_heads, d_head, d_head), jnp.float32, -bound, bound)
    bk = jax.random.uniform(kbk, (n_heads, d_head), jnp.float32, -bound, bound)
    wv = jax.random.uniform(kwv, (n_heads, d_head, d_head), jnp.float32, -bound, bound)
    bv = jax.random.uniform(kbv, (n_heads, d_head), jnp.float32, -bound, bound)

    out = my_msa(x, wq, bq, wk, bk, wv, bv)
    jax.block_until_ready(out)

    ref = my_msa_ref(x, wq, bq, wk, bk, wv, bv)
    # Looser tolerance: bf16 MXU operands + approx reciprocal (per perf review).
    np.testing.assert_allclose(np.asarray(out), np.asarray(ref), rtol=2e-2, atol=2e-2)

    print("KERNEL_OK")
</pallas_src>

<mosaic_0001>
module attributes {stable_mosaic.version = 11 : i64} {
  func.func @msa_kernel(%arg0: i32, %arg1: memref<1x8x32xf32, #tpu.memory_space<vmem>>, %arg2: memref<32x96xf32, #tpu.memory_space<vmem>>, %arg3: memref<1x96xf32, #tpu.memory_space<vmem>>, %arg4: memref<1x8x32xf32, #tpu.memory_space<vmem>>) attributes {dimension_semantics = [#tpu.dimension_semantics<parallel>], iteration_bounds = array<i64: 2>, scalar_prefetch = 0 : i64, scratch_operands = 0 : i64, tpu.core_type = #tpu.core_type<tc>, window_params = [{transform_indices = @transform_0, window_bounds = array<i64: 1, 8, 32>}, {pipeline_mode = #tpu.pipeline_mode<synchronous>, transform_indices = @transform_1, window_bounds = array<i64: 32, 96>}, {pipeline_mode = #tpu.pipeline_mode<synchronous>, transform_indices = @transform_2, window_bounds = array<i64: 1, 96>}, {transform_indices = @transform_3, window_bounds = array<i64: 1, 8, 32>}]} {
    %c0 = arith.constant 0 : index
    %c0_0 = arith.constant 0 : index
    %c0_1 = arith.constant 0 : index
    %0 = vector.load %arg1[%c0, %c0_0, %c0_1] : memref<1x8x32xf32, #tpu.memory_space<vmem>>, vector<1x8x32xf32>
    %1 = vector.shape_cast %0 : vector<1x8x32xf32> to vector<8x32xf32>
    %c0_2 = arith.constant 0 : index
    %c0_3 = arith.constant 0 : index
    %2 = vector.load %arg2[%c0_2, %c0_3] : memref<32x96xf32, #tpu.memory_space<vmem>>, vector<32x96xf32>
    %cst = arith.constant dense<0.000000e+00> : vector<8x96xf32>
    %3 = tpu.matmul %1, %2, %cst {dimension_numbers = #tpu.dot_dimension_numbers<[1], [0], [0], [1], [0, 0, 1, 1], [], []>} : vector<8x32xf32>, vector<32x96xf32>, vector<8x96xf32> -> vector<8x96xf32>
    %c0_4 = arith.constant 0 : index
    %c0_5 = arith.constant 0 : index
    %4 = vector.load %arg3[%c0_4, %c0_5] : memref<1x96xf32, #tpu.memory_space<vmem>>, vector<1x96xf32>
    %5 = vector.shape_cast %4 : vector<1x96xf32> to vector<96xf32>
    %6 = vector.shape_cast %5 : vector<96xf32> to vector<1x96xf32>
    %7 = vector.broadcast %6 : vector<1x96xf32> to vector<8x96xf32>
    %8 = arith.addf %3, %7 : vector<8x96xf32>
    %9 = vector.extract_strided_slice %8 {offsets = [0, 0], sizes = [8, 16], strides = [1, 1]} : vector<8x96xf32> to vector<8x16xf32>
    %10 = vector.extract_strided_slice %8 {offsets = [0, 32], sizes = [8, 16], strides = [1, 1]} : vector<8x96xf32> to vector<8x16xf32>
    %11 = vector.extract_strided_slice %8 {offsets = [0, 64], sizes = [8, 16], strides = [1, 1]} : vector<8x96xf32> to vector<8x16xf32>
    %12 = arith.truncf %9 : vector<8x16xf32> to vector<8x16xbf16>
    %13 = arith.truncf %10 : vector<8x16xf32> to vector<8x16xbf16>
    %cst_6 = arith.constant dense<0.000000e+00> : vector<8x8xf32>
    %14 = tpu.matmul %12, %13, %cst_6 {dimension_numbers = #tpu.dot_dimension_numbers<[1], [1], [0], [0], [0, 0, 1, 0], [], []>} : vector<8x16xbf16>, vector<8x16xbf16>, vector<8x8xf32> -> vector<8x8xf32>
    %cst_7 = arith.constant dense<0xFF800000> : vector<8xf32>
    %15 = vector.multi_reduction <maximumf>, %14, %cst_7 [1] : vector<8x8xf32> to vector<8xf32>
    %16 = vector.shape_cast %15 : vector<8xf32> to vector<8x1xf32>
    %17 = vector.broadcast %16 : vector<8x1xf32> to vector<8x8xf32>
    %18 = arith.subf %14, %17 : vector<8x8xf32>
    %19 = math.exp %18 : vector<8x8xf32>
    %cst_8 = arith.constant dense<0.000000e+00> : vector<8xf32>
    %20 = vector.multi_reduction <add>, %19, %cst_8 [1] : vector<8x8xf32> to vector<8xf32>
    %21 = vector.shape_cast %20 : vector<8xf32> to vector<8x1xf32>
    %22 = tpu.reciprocal %21 {approx = true} : vector<8x1xf32> -> vector<8x1xf32>
    %23 = vector.broadcast %22 : vector<8x1xf32> to vector<8x8xf32>
    %24 = arith.mulf %19, %23 : vector<8x8xf32>
    %25 = arith.truncf %24 : vector<8x8xf32> to vector<8x8xbf16>
    %26 = arith.truncf %11 : vector<8x16xf32> to vector<8x16xbf16>
    %cst_9 = arith.constant dense<0.000000e+00> : vector<8x16xf32>
    %27 = tpu.matmul %25, %26, %cst_9 {dimension_numbers = #tpu.dot_dimension_numbers<[1], [0], [0], [1], [0, 0, 1, 1], [], []>} : vector<8x8xbf16>, vector<8x16xbf16>, vector<8x16xf32> -> vector<8x16xf32>
    %28 = vector.extract_strided_slice %8 {offsets = [0, 16], sizes = [8, 16], strides = [1, 1]} : vector<8x96xf32> to vector<8x16xf32>
    %29 = vector.extract_strided_slice %8 {offsets = [0, 48], sizes = [8, 16], strides = [1, 1]} : vector<8x96xf32> to vector<8x16xf32>
    %30 = vector.extract_strided_slice %8 {offsets = [0, 80], sizes = [8, 16], strides = [1, 1]} : vector<8x96xf32> to vector<8x16xf32>
    %31 = arith.truncf %28 : vector<8x16xf32> to vector<8x16xbf16>
    %32 = arith.truncf %29 : vector<8x16xf32> to vector<8x16xbf16>
    %cst_10 = arith.constant dense<0.000000e+00> : vector<8x8xf32>
    %33 = tpu.matmul %31, %32, %cst_10 {dimension_numbers = #tpu.dot_dimension_numbers<[1], [1], [0], [0], [0, 0, 1, 0], [], []>} : vector<8x16xbf16>, vector<8x16xbf16>, vector<8x8xf32> -> vector<8x8xf32>
    %cst_11 = arith.constant dense<0xFF800000> : vector<8xf32>
    %34 = vector.multi_reduction <maximumf>, %33, %cst_11 [1] : vector<8x8xf32> to vector<8xf32>
    %35 = vector.shape_cast %34 : vector<8xf32> to vector<8x1xf32>
    %36 = vector.broadcast %35 : vector<8x1xf32> to vector<8x8xf32>
    %37 = arith.subf %33, %36 : vector<8x8xf32>
    %38 = math.exp %37 : vector<8x8xf32>
    %cst_12 = arith.constant dense<0.000000e+00> : vector<8xf32>
    %39 = vector.multi_reduction <add>, %38, %cst_12 [1] : vector<8x8xf32> to vector<8xf32>
    %40 = vector.shape_cast %39 : vector<8xf32> to vector<8x1xf32>
    %41 = tpu.reciprocal %40 {approx = true} : vector<8x1xf32> -> vector<8x1xf32>
    %42 = vector.broadcast %41 : vector<8x1xf32> to vector<8x8xf32>
    %43 = arith.mulf %38, %42 : vector<8x8xf32>
    %44 = arith.truncf %43 : vector<8x8xf32> to vector<8x8xbf16>
    %45 = arith.truncf %30 : vector<8x16xf32> to vector<8x16xbf16>
    %cst_13 = arith.constant dense<0.000000e+00> : vector<8x16xf32>
    %46 = tpu.matmul %44, %45, %cst_13 {dimension_numbers = #tpu.dot_dimension_numbers<[1], [0], [0], [1], [0, 0, 1, 1], [], []>} : vector<8x8xbf16>, vector<8x16xbf16>, vector<8x16xf32> -> vector<8x16xf32>
    %47 = tpu.concatenate %27, %46 in 1 : vector<8x16xf32>, vector<8x16xf32> -> vector<8x32xf32>
    %c0_14 = arith.constant 0 : index
    %c0_15 = arith.constant 0 : index
    %c0_16 = arith.constant 0 : index
    %48 = vector.load %arg4[%c0_14, %c0_15, %c0_16] : memref<1x8x32xf32, #tpu.memory_space<vmem>>, vector<1x8x32xf32>
    %49 = vector.shape_cast %48 : vector<1x8x32xf32> to vector<8x32xf32>
    %50 = vector.shape_cast %47 : vector<8x32xf32> to vector<1x8x32xf32>
    tpu.vector_store %arg4[%c0_14, %c0_15, %c0_16], %50 {strides = array<i32>} : memref<1x8x32xf32, #tpu.memory_space<vmem>>, vector<1x8x32xf32>,
    return
  }
  func.func @transform_0(%arg0: i32) -> (i32, i32, i32) {
    %c0_i32 = arith.constant 0 : i32
    %c0_i32_0 = arith.constant 0 : i32
    %c0_i32_1 = arith.constant 0 : i32
    return %arg0, %c0_i32, %c0_i32_0 : i32, i32, i32
  }
  func.func @transform_1(%arg0: i32) -> (i32, i32) {
    %c0_i32 = arith.constant 0 : i32
    %c0_i32_0 = arith.constant 0 : i32
    %c0_i32_1 = arith.constant 0 : i32
    return %c0_i32, %c0_i32_0 : i32, i32
  }
  func.func @transform_2(%arg0: i32) -> (i32, i32) {
    %c0_i32 = arith.constant 0 : i32
    %c0_i32_0 = arith.constant 0 : i32
    %c0_i32_1 = arith.constant 0 : i32
    return %c0_i32, %c0_i32_0 : i32, i32
  }
  func.func @transform_3(%arg0: i32) -> (i32, i32, i32) {
    %c0_i32 = arith.constant 0 : i32
    %c0_i32_0 = arith.constant 0 : i32
    %c0_i32_1 = arith.constant 0 : i32
    return %arg0, %c0_i32, %c0_i32_0 : i32, i32, i32
  }
}

</mosaic_0001>

<bundles_post_ra>
// kernel: tpu_custom_call.1
= control target key start
LH: loop header
LB: loop body
LE: loop exit
PB: predicated region body
PF: predicated region fallthrough
CT: control target
= control target key end

     0   :  { %8 = vsyncpa [#allocation3], 0  ;;  %s1155_s0 = inlined_call_operand.hbm [shape: f32[2,8,32], index: 0, kind: input, shape index: {}]   ;;  %s1156_s1 = inlined_call_operand.hbm [shape: f32[32,96], index: 1, kind: input, shape index: {}]   ;;  %s1157_s2 = inlined_call_operand.vmem [shape: f32[1,96], index: 2, kind: input, shape index: {}]   ;;  %s1158_s3 = inlined_call_operand.hbm [shape: f32[2,8,32], index: 3, kind: output, shape index: {}]  }
   0x1   :  { %10 = vsyncpa [#allocation3 + $0x1], 0 }
   0x2   :  { %11 = vsyncpa [#allocation6], 0 }
   0x3   :  { %12 = vsyncpa [#allocation4], 0 }
   0x4   :  { %14 = vsyncpa [#allocation4 + $0x1], 0  ;;  %s925_s12 = smov 0   ;;  %s927_s13 = smov 0  }
   0x5   :  { %s929_s14 = smov 0   ;;  %s931_s15 = smov 0  }
   0x6 LB: > { %s946_s16 = sadd.s32 4294967295, %s889_s15   ;;  %s611_s17 = sadd.s32 4294967294, %s889_s15   ;;  %s889_s15 = sphi %s931_s15, %s1178_s15   ;;  %s885_s14 = sphi %s929_s14, %s1177_s14   ;;  %s881_s13 = sphi %s927_s13, %s1176_s13   ;;  %s877_s12 = sphi %s925_s12, %s1175_s12  }
   0x7   : > { %p40_p0 = scmp.ne.s32.totalorder %s881_s13, %s877_s12  ;;  %p1159_p1 = scmp.eq.s32.totalorder %s946_s16, 0 }
   0x8   : > { %p112_p3 = scmp.eq.s32.totalorder %s611_s17, 1  ;;  %p612_p5 = scmp.ge.s32.totalorder %s889_s15, 1 }
   0x9   : > { %p955_p4 = por %p1159_p1, %p40_p0  ;;  %p119_p7 = scmp.lt.s32.totalorder %s889_s15, 3 }
   0xa   : > { %p960_p6 = por %p112_p3, %p40_p0  ;;  %s891_s21 = smov [#allocation5]  }
   0xb   : > { %s1162_s18 = scalar_select %p955_p4, 1, 0 }
   0xc   : > { %s1163_s19 = scalar_select %p960_p6, 1, 0 }
   0xd   : > { %p965_p8 = pnand %p612_p5, %p119_p7  ;;  %s131_s22 = sshll.u32 %s891_s21, 4  ;;  %s969_s22 = int_to_ptr.vmem [resolvable:$true] %s131_s22 }
   0xe   : > { %s981_s24 = sadd.s32 1, %s889_s15   ;;  %s27_s25 = sadd.s32 1, %s885_s14 }
   0xf   : > { %s1164_s20 = scalar_select %p965_p8, 1, 0 }
  0x10   : > { %p693_p9 = pneg %p965_p8  ;;  %s24_s26 = ssub.s32 %s889_s15, %s981_s24 }
  0x11   : > { %s761_s29 = scalar_lea.hbm %s1156_s1, 512 }
  0x12   : > { %p976_p11 = pnand %p693_p9, %p1159_p1  ;;  %p762_p12 = scmp.ne.s32.totalorder %s1156_s1, %s761_s29 }
  0x13   : > { %p768_p5 = scmp.lt.u32.totalorder %s761_s29, %s1156_s1 }
  0x14   : > { %p763_p13 = pneg %p976_p11 }
  0x16   : > { %p764_p0 = pnand %p763_p13, %p762_p12 }
  0x18   : > { %p765_p3 = pneg %p764_p0 }
  0x1a   : > { %p770_p7 = pnand %p768_p5, %p765_p3 }
  0x1c   : > { %773 = shalt.err (!%p770_p7)
}
  0x1d   : > { %s774_s7 = scalar_lea.vmem %s969_s22, 512  ;;  %p782_p2 = scmp.lt.s32.totalorder %s969_s22, %s969_s22 }
  0x1e   : > { %p775_p9 = scmp.ne.s32.totalorder %s969_s22, %s774_s7  ;;  %p783_p6 = scmp.lt.s32.totalorder %s774_s7, %s774_s7 }
  0x20   : > { %p777_p10 = pnand %p775_p9, %p763_p13  ;;  %p784_p4 = por %p783_p6, %p782_p2 }
  0x22   : > { %p778_p1 = pneg %p777_p10 }
  0x24   : > { %p785_p8 = pnand %p784_p4, %p778_p1 }
  0x26   : > { %788 = shalt.err (!%p785_p8)
}
  0x27   : > { %s892_s8 = smov 128   ;;  %s893_s9 = smov 8  }
  0x28   : > { %696 = dma.hbm_to_vmem [thread:$0]  (!%p976_p11), %s1156_s1, 512, %s969_s22, [#allocation6], %s892_s8, %s892_s8, %s893_s9  }
  0x29   : > { %p25_p2 = scmp.eq.s32.totalorder %s24_s26, 0  ;;  %p34_p1 = scmp.ne.s32.totalorder %s885_s14, %s881_s13 }
  0x2a   : > { %p35_p4 = scmp.eq.s32.totalorder %s889_s15, 0  ;;  %p706_p6 = scmp.lt.s32.totalorder %s889_s15, 2 }
  0x2b   : > { %s1012_s17 = scalar_select %p25_p2, %s885_s14, %s27_s25  }
  0x2c   : > { %p36_p8 = por %p35_p4, %p34_p1  ;;  %p1166_p10 = scmp.eq.s32.totalorder %s946_s16, 1 }
  0x2d   : > { %s148_s27 = sand.u32 1, %s885_s14   ;;  %s616_s28 = sshll.u32 %s889_s15, 7 }
  0x2e   : > { %p1016_p12 = por %p1166_p10, %p34_p1  ;;  %s615_s29 = sshll.u32 %s148_s27, 3 }
  0x2f   : > { %s1025_s4 = scalar_lea.hbm %s1155_s0, %s616_s28  ;;  %s152_s22 = scalar_lea.vmem [#allocation2], %s615_s29 }
  0x30   : > { %s159_s25 = sshll.u32 %s152_s22, 4  ;;  %p1027_p11 = pnand %p706_p6, %p36_p8  ;;  %s1031_s25 = int_to_ptr.vmem [resolvable:$true] %s159_s25 }
  0x31   : > { %s149_s5 = scalar_lea.sflag [#allocation3], %s148_s27  ;;  %s789_s6 = scalar_lea.hbm %s1025_s4, 128 }
  0x32   : > { %p790_p13 = scmp.ne.s32.totalorder %s1025_s4, %s789_s6  ;;  %p791_p0 = pneg %p1027_p11 }
  0x33   : > { %s794_s9 = scalar_lea.hbm %s1155_s0, 256  ;;  %p795_p7 = scmp.lt.u32.totalorder %s1025_s4, %s1155_s0 }
  0x34   : > { %p792_p3 = pnand %p791_p0, %p790_p13  ;;  %p796_p9 = scmp.lt.u32.totalorder %s794_s9, %s789_s6 }
  0x35   : > { %p798_p1 = scmp.lt.u32.totalorder %s789_s6, %s1025_s4 }
  0x36   : > { %p793_p5 = pneg %p792_p3  ;;  %p797_p2 = por %p796_p9, %p795_p7 }
  0x38   : > { %p799_p4 = por %p798_p1, %p797_p2 }
  0x3a   : > { %p800_p6 = pnand %p799_p4, %p793_p5 }
  0x3c   : > { %803 = shalt.err (!%p800_p6)
}
  0x3d   : > { %s804_s27 = scalar_lea.vmem %s1031_s25, 128  ;;  %s894_s28 = smov [#allocation2]  }
  0x3e   : > { %p805_p8 = scmp.ne.s32.totalorder %s1031_s25, %s804_s27  ;;  %s809_s29 = sshll.u32 %s894_s28, 4  ;;  %s810_s29 = int_to_ptr.vmem [resolvable:$false] %s809_s29 }
  0x3f   : > { %s811_s23 = scalar_lea.vmem %s810_s29, 256  ;;  %p812_p3 = scmp.lt.s32.totalorder %s1031_s25, %s810_s29 }
  0x40   : > { %p807_p10 = pnand %p805_p8, %p791_p0  ;;  %p813_p7 = scmp.lt.s32.totalorder %s811_s23, %s804_s27 }
  0x42   : > { %p808_p13 = pneg %p807_p10  ;;  %p814_p9 = por %p813_p7, %p812_p3 }
  0x44   : > { %p815_p2 = pnand %p814_p9, %p808_p13 }
  0x46   : > { %818 = shalt.err (!%p815_p2)
}
  0x47   : > { %700 = dma.hbm_to_vmem [thread:$0]  (!%p1027_p11), %s1025_s4, 128, %s1031_s25, %s149_s5  }
  0x48   : > { %p1169_p5 = scmp.ne.s32.totalorder %s1164_s20, 0 }
  0x49   : > { %s1061_s30 = sand.u32 (!%p1169_p5), 1, %s881_s13   ;;  %p1170_p0 = scmp.ne.s32.totalorder (!%p1169_p5), %s1162_s18, 0 }
  0x4a   : > { %168 = sbr.rel (%p1169_p5) target bundleno = 1312 (0x520), region = 32  ;;  %s618_s22 = sshll.u32 (!%p1169_p5), %s1061_s30, 3 }
  0x4b   : > { %s171_s6 = scalar_lea.sflag (!%p1169_p5), [#allocation3], %s1061_s30  ;;  %s174_s7 = scalar_lea.vmem (!%p1169_p5), [#allocation2], %s618_s22 }
  0x51   : > { %864 = dma.done.wait (%p1170_p0), %s171_s6, 128  }
  0x52   : > { %866 = vsyncadd (%p1170_p0), %s171_s6, 4294967168  ;;  %p1171_p11 = scmp.eq.s32.totalorder %s946_s16, 0 }
  0x54   : > { %868 = dma.done.wait (%p1171_p11), [#allocation6], 512   ;;  %p1172_p1 = pmov %p1171_p11 }
  0x55   : > { %v895_v0 = vmov 0.0|0.0   ;;  %vm896_vm0 = vmmov 0   ;;  %v897_v1 = vmov 0.0   ;;  %v203_v2 = vld [vmem:[#allocation5] sm:$0xff]  ;;  %v204_v3 = vld [vmem:[#allocation5 + $0x8] sm:$0xff]  ;;  %v205_v4 = vld [vmem:[#allocation5 + $0x10] sm:$0xff] }
  0x56   : > { %870 = vsyncadd (%p1172_p1), [#allocation6], 4294966784  ;;  %679 = vmatprep.subr.bf16.mxu0 %v895_v0  ;;  %652 = vmatprep.mubr.msk.f32.mxu0 %vm896_vm0, %v897_v1  ;;  %v680_v5 = vpack.c.bf16 %v204_v3, %v203_v2  ;;  %v206_v6 = vld [vmem:[#allocation5 + $0x18] sm:$0xff]  ;;  %vm214_vm1 = vcmask 261120   ;;  %v621_v9 = vld [vmem:[%s1157_s2] ss:$0 sm:$0xff] }
  0x57   : > { %655 = vmatprep.subr.bf16.mxu1 %v897_v1  ;;  %657 = vmatprep.mubr.msk.bf16.mxu1 %vm896_vm0, %v897_v1  ;;  %v683_v7 = vpack.c.bf16 %v206_v6, %v205_v4  ;;  %v202_v8 = vld [vmem:[%s174_s7] sm:$0xff]  ;;  %s898_s4 = smov 112   ;;  %s899_s25 = smov 96   ;;  %vm292_vm2 = vcmask 130048   ;;  %vm339_vm3 = vcmask 64512   ;;  %vm357_vm4 = vcmask 1043456  }
  0x58   : > { %681 = vmatpush3.bf16.msra.mxu0 %v680_v5  ;;  %s900_s26 = smov 80   ;;  %s901_s5 = smov 64  }
  0x59   : > { %682 = vmatprep.subr.bf16.mxu0 %v895_v0  ;;  %s902_s8 = smov 48   ;;  %s903_s9 = smov 16  }
  0x5a   : > { %s628_s10 = sshll.u32 %s946_s16, 7  ;;  %s200_s11 = scalar_lea.vmem [#allocation7], %s618_s22 }
  0x5b   : > { %s531_s27 = sshll.u32 %s200_s11, 4  ;;  %s1109_s23 = scalar_lea.hbm %s1158_s3, %s628_s10  ;;  %s1111_s27 = int_to_ptr.vmem [resolvable:$true] %s531_s27 }
  0x5c   : > { %684 = vmatpush3.bf16.msra.mxu0 %v683_v7  ;;  %s518_s6 = scalar_lea.sflag [#allocation4], %s1061_s30  ;;  %s819_s16 = scalar_lea.vmem %s1111_s27, 128 }
  0x5d   : > { %661 = vmatprep.subr.bf16.mxu0 %v897_v1  ;;  %p820_p4 = scmp.ne.s32.totalorder %s1111_s27, %s819_s16  ;;  %s904_s22 = smov [#allocation7]  }
  0x5e   : > { %s823_s7 = sshll.u32 %s904_s22, 4  ;;  %s824_s7 = int_to_ptr.vmem [resolvable:$false] %s823_s7 }
  0x5f   : > { %653 = vmatmul.mubr.msk.f32.vlgmr.msra.gmra.mrb[0].mxu0 %vm214_vm1, %v202_v8  ;;  %p821_p6 = pnand %p820_p4, %p1016_p12  ;;  %s825_s18 = scalar_lea.vmem %s824_s7, 256 }
  0x60   : > { %663 = vmatprep.mubr.msk.bf16.mxu0 %vm896_vm0, %v897_v1  ;;  %p826_p10 = scmp.lt.s32.totalorder %s1111_s27, %s824_s7  ;;  %p827_p13 = scmp.lt.s32.totalorder %s825_s18, %s819_s16 }
  0x61   : > { %p822_p8 = pneg %p821_p6 }
  0x62   : > { %p828_p3 = por %p827_p13, %p826_p10 }
  0x64   : > { %p829_p7 = pnand %p828_p3, %p822_p8 }
 0x132   : > { %v284_v10 = vpop.f32.mrb[0].mxu0 }
 0x133   : > { %v285_v11 = vadd.f32 %v621_v9, %v284_v10  ;;  %v654_v12 = vpop.f32.mrb[1].mxu0 }
 0x135   : > { %v288_v13 = vpack.c.bf16 %v285_v11, %v285_v11 }
 0x137   : > { %401 = vrot.lane.b32.xlu1 %v288_v13, %s898_s4  ;;  %290 = vrot.lane.b32.xlu0 %v288_v13, %s899_s25 }
 0x13b   : > { %403 = vrot.lane.b32.xlu0 %v288_v13, %s900_s26 }
 0x1a9   : > { %v291_v14 = vpop.permute.xlu0 %290  ;;  %v402_v18 = vpop.permute.xlu1 %401 }
 0x1aa   : > { %v297_v15 = vsel %vm292_vm2, %v291_v14, 0 }
 0x1ab   : > { %656 = vmatpush3.bf16.xpose.msra.mxu1 %v297_v15 }
 0x1ac   : > { %667 = vmatprep.subr.bf16.mxu1 %v897_v1 }
 0x1ad   : > { %v404_v16 = vpop.permute.xlu0 %403 }
 0x1ae   : > { %v409_v17 = vsel %vm292_vm2, %v404_v16, 0 }
 0x1b2   : > { %658 = vmatmul.mubr.msk.bf16.vlgmr.msra.gmra.mrb[0].mxu1 %vm292_vm2, %v288_v13 }
 0x1b3   : > { %668 = vmatpush3.bf16.xpose.msra.mxu1 %v409_v17  ;;  %669 = vmatprep.mubr.msk.bf16.mxu1 %vm896_vm0, %v897_v1 }
 0x1ba   : > { %670 = vmatmul.mubr.msk.bf16.vlgmr.msra.gmra.mrb[4].mxu1 %vm292_vm2, %v402_v18 }
 0x285   : > { %v333_v19 = vpop.f32.mrb[0].mxu1 }
 0x286   : > { %v659_v20 = vpop.f32.mrb[1].mxu1  ;;  %v340_v21 = vsel %vm339_vm3, %v333_v19, -inf }
 0x287   : > { %341 = vmax.xlane.f32.xlu1 %v340_v21  ;;  %v336_v22 = vpop.f32.mrb[2].mxu1 }
 0x288   : > { %v660_v23 = vpop.f32.mrb[3].mxu1 }
 0x28d   : > { %v445_v24 = vpop.f32.mrb[4].mxu1 }
 0x28e   : > { %v671_v25 = vpop.f32.mrb[5].mxu1  ;;  %v451_v26 = vsel %vm339_vm3, %v445_v24, -inf }
 0x28f   : > { %452 = vmax.xlane.f32.xlu0 %v451_v26  ;;  %v448_v27 = vpop.f32.mrb[6].mxu1 }
 0x290   : > { %v672_v28 = vpop.f32.mrb[7].mxu1 }
 0x314   : > { %v342_v29 = vpop.xlane.xlu1 %341 }
 0x315   : > { %v343_v30 = vsub.f32 %v333_v19, %v342_v29 }
 0x317   : > { %v344_v31 = vmul.f32 1.442695, %v343_v30 }
 0x319   : > { %753 = vpow2.f32 %v344_v31 }
 0x31c   : > { %v453_v32 = vpop.xlane.xlu0 %452 }
 0x31d   : > { %v454_v33 = vsub.f32 %v445_v24, %v453_v32 }
 0x31f   : > { %v455_v34 = vmul.f32 1.442695, %v454_v33 }
 0x321   : > { %755 = vpow2.f32 %v455_v34 }
 0x323   : > { %v754_v35 = vpop.eup %753 }
 0x324   : > { %v346_v36 = vsel %vm339_vm3, %v754_v35, 0.0 }
 0x325   : > { %347 = vadd.xlane.f32.xlu0 %v346_v36 }
 0x32b   : > { %v756_v37 = vpop.eup %755 }
 0x32c   : > { %v457_v38 = vsel %vm339_vm3, %v756_v37, 0.0 }
 0x32d   : > { %458 = vadd.xlane.f32.xlu1 %v457_v38 }
 0x33b   : > { %352 = vrot.lane.b32.xlu0 %v288_v13, %s901_s5 }
 0x33e   : > { %463 = vrot.lane.b32.xlu1 %v288_v13, %s902_s8 }
 0x3b2   : > { %v348_v39 = vpop.xlane.xlu0 %347 }
 0x3b3   : > { %757 = vrcp.f32 %v348_v39 }
 0x3b6   : > { %v353_v40 = vpop.permute.xlu0 %352 }
 0x3b7   : > { %v359_v41 = vsel %vm357_vm4, %v353_v40, 0 }
 0x3b8   : > { %662 = vmatpush3.bf16.msra.mxu0 %v359_v41 }
 0x3b9   : > { %673 = vmatprep.subr.bf16.mxu0 %v897_v1 }
 0x3ba   : > { %v459_v42 = vpop.xlane.xlu1 %458 }
 0x3bb   : > { %759 = vrcp.f32 %v459_v42 }
 0x3bd   : > { %v758_v43 = vpop.eup %757 }
 0x3be   : > { %v350_v44 = vmul.f32 %v758_v43, %v754_v35  ;;  %v464_v45 = vpop.permute.xlu1 %463 }
 0x3bf   : > { %v469_v47 = vsel %vm357_vm4, %v464_v45, 0 }
 0x3c0   : > { %v351_v46 = vpack.c.bf16 %v350_v44, %v350_v44 }
 0x3c2   : > { %664 = vmatmul.mubr.msk.bf16.vlgmr.msra.gmra.mrb[4].mxu0 %vm339_vm3, %v351_v46 }
 0x3c3   : > { %674 = vmatpush3.bf16.msra.mxu0 %v469_v47  ;;  %675 = vmatprep.mubr.msk.bf16.mxu0 %vm896_vm0, %v897_v1 }
 0x3c5   : > { %v760_v48 = vpop.eup %759 }
 0x3c6   : > { %v461_v49 = vmul.f32 %v760_v48, %v756_v37 }
 0x3c8   : > { %v462_v50 = vpack.c.bf16 %v461_v49, %v461_v49 }
 0x3ca   : > { %676 = vmatmul.mubr.msk.bf16.vlgmr.msra.gmra.mrb[8].mxu0 %vm339_vm3, %v462_v50 }
 0x495   : > { %v395_v51 = vpop.f32.mrb[4].mxu0 }
 0x496   : > { %v665_v52 = vpop.f32.mrb[5].mxu0 }
 0x497   : > { %v398_v53 = vpop.f32.mrb[6].mxu0 }
 0x498   : > { %v666_v54 = vpop.f32.mrb[7].mxu0 }
 0x49d   : > { %v505_v55 = vpop.f32.mrb[8].mxu0 }
 0x49e   : > { %512 = vrot.lane.b32.xlu1 %v505_v55, %s903_s9  ;;  %v677_v56 = vpop.f32.mrb[9].mxu0 }
 0x49f   : > { %v508_v57 = vpop.f32.mrb[10].mxu0 }
 0x4a0   : > { %v678_v58 = vpop.f32.mrb[11].mxu0 }
 0x510   : > { %v513_v59 = vpop.permute.xlu1 %512 }
 0x511   : > { %v515_v60 = vsel %vm292_vm2, %v395_v51, %v513_v59 }
 0x512   : > { %516 = vst.msk [vmem:[%s200_s11] sm:$0xff] %vm214_vm1, %v515_v60 }
 0x513   : > { %832 = shalt.err (!%p829_p7)
}
 0x514   : > { %s833_s30 = scalar_lea.hbm %s1109_s23, 128  ;;  %s837_s25 = scalar_lea.hbm %s1158_s3, 256 }
 0x515   : > { %p834_p9 = scmp.ne.s32.totalorder %s1109_s23, %s833_s30  ;;  %p838_p0 = scmp.lt.u32.totalorder %s1109_s23, %s1158_s3 }
 0x516   : > { %p839_p11 = scmp.lt.u32.totalorder %s837_s25, %s833_s30  ;;  %p841_p4 = scmp.lt.u32.totalorder %s833_s30, %s1109_s23 }
 0x517   : > { %p835_p2 = pnand %p834_p9, %p1016_p12 }
 0x518   : > { %p840_p1 = por %p839_p11, %p838_p0 }
 0x519   : > { %p836_p5 = pneg %p835_p2 }
 0x51a   : > { %p842_p6 = por %p841_p4, %p840_p1 }
 0x51c   : > { %p843_p8 = pnand %p842_p6, %p836_p5 }
 0x51e   : > { %846 = shalt.err (!%p843_p8)
}
 0x51f   : > { %691 = dma.vmem_to_hbm [thread:$0]  (%p1016_p12), %s1111_s27, 128, %s1109_s23, %s518_s6  }
 0x520 PF: > { %s543_s8 = sand.u32 1, %s877_s12   ;;  %p1173_p10 = scmp.ne.s32.totalorder %s1163_s19, 0 }
 0x521   : > { %p1174_p13 = scmp.ge.s32.totalorder %s889_s15, 2  ;;  %s544_s9 = scalar_lea.sflag [#allocation4], %s543_s8 }
 0x523   : > { %p702_p3 = pnand %p1174_p13, %p1173_p10 }
 0x525   : > { %872 = dma.done.wait (!%p702_p3), %s544_s9, 128  }
 0x526   : > { %874 = vsyncadd (!%p702_p3), %s544_s9, 4294967168  ;;  %p17_p7 = scmp.ge.s32.totalorder %s981_s24, 4   ;;  %s1175_s12 = smov %s881_s13 }
 0x527   : > { %s1176_s13 = smov %s885_s14  ;;  %s1177_s14 = smov %s1012_s17 }
 0x528   : > { %s1178_s15 = smov %s981_s24  ;;  %19 = sbr.rel (!%p17_p7) target bundleno = 6 (0x6), region = 81 }
 0x52f   :  { %549 = vsyncpa [#allocation3], 1 }
 0x530   :  { %551 = vsyncpa [#allocation3 + $0x1], 1 }
 0x531   :  { %552 = vsyncpa [#allocation6], 1 }
 0x532   :  { %553 = vsyncpa [#allocation4], 1 }
 0x533   :  { %555 = vsyncpa [#allocation4 + $0x1], 1 }

</bundles_post_ra>
